<compile_context>
chip_gen: v5e
topology: v5e:2x2
jax: 0.10.0
libtpu: 0.0.40
codegen_flags: <defaults>
</compile_context>

<pallas_src>
from functools import partial
import math

import jax
import jax.numpy as jnp
from jax import lax
from jax.experimental import pallas as pl
from jax.experimental.pallas import tpu as pltpu


def _group_contrastive_kernel(zi_q_ref, zj_q_ref, zj_full_ref, csum_i_ref, csum_j_ref,
                              loss_i_ref, pos_j_ref, den_j_ref,
                              *, inv_bm1, pad_rows):
    f32 = jnp.float32
    t = pl.program_id(0)

    zi_q = zi_q_ref[...]          # (TB, D) bf16, pre-normalized and scaled by sqrt(1/T)
    zj_q = zj_q_ref[...]          # (TB, D) bf16

    # ---- positives via the column-sum matvec identity (no same-view Gram blocks) ----
    # pos = (z_row . sum_k z_k - ||z_row||^2) / (B - 1); the folded sqrt(1/T) makes this
    # positives / T directly.  All VPU work, O(TB * D).
    zi_f = zi_q.astype(f32)
    zj_f = zj_q.astype(f32)
    pos_i = (jnp.sum(zi_f * csum_i_ref[...], axis=1, keepdims=True)
             - jnp.sum(zi_f * zi_f, axis=1, keepdims=True)) * inv_bm1
    pos_j = (jnp.sum(zj_f * csum_j_ref[...], axis=1, keepdims=True)
             - jnp.sum(zj_f * zj_f, axis=1, keepdims=True)) * inv_bm1

    # ---- single cross block S_ij = Zi_tile @ Zj^T (already / T via the folded scale) ----
    nt = (((1,), (1,)), ((), ()))                 # contract the feature dim of both operands
    s_ij = lax.dot_general(zi_q, zj_full_ref[...], nt, preferred_element_type=f32)
    e_ij = jnp.exp(s_ij)                          # exp evaluated once per (row, col) pair

    # i-half denominators: row sums.  Zero-padded zj columns contribute exactly exp(0)=1
    # each, so subtract the static pad count.
    den_i = jnp.sum(e_ij, axis=1, keepdims=True) - pad_rows
    # -log(num / (num + den)) == log(exp(pos) + den) - pos   (no divide)
    loss_i_ref[...] = jnp.log(jnp.exp(pos_i) + den_i) - pos_i
    pos_j_ref[...] = pos_j

    # j-half denominators: column sums of the SAME exp block (S_ji == S_ij^T), accumulated
    # across row tiles.  Constant-index output block stays resident in VMEM.
    col_part = jnp.sum(e_ij, axis=0, keepdims=True)           # (1, B_pad)

    @pl.when(t == 0)
    def _():
        den_j_ref[...] = col_part

    @pl.when(t != 0)
    def _():
        den_j_ref[...] += col_part


def _round_up(x, m):
    return (x + m - 1) // m * m


def group_contrastive_loss(emb_i, emb_j, temperature=0.5):
    B, D = emb_i.shape
    assert emb_j.shape == (B, D)

    inv_temp = 1.0 / float(temperature)
    scale = math.sqrt(inv_temp)                   # fold sqrt(1/T) into z so z.z' == sim / T

    def norm_scale(x):
        # F.normalize(x, dim=1, eps=1e-12) == x * rsqrt(max(sum(x^2), eps^2)), then scale
        # by sqrt(1/T) and cast to bf16 for the MXU operands.  Runs ONCE, in XLA.
        x = x.astype(jnp.float32)
        ss = jnp.sum(x * x, axis=1, keepdims=True)
        r = lax.rsqrt(jnp.maximum(ss, 1e-24))
        return (x * (r * scale)).astype(jnp.bfloat16)

    zi = norm_scale(emb_i)
    zj = norm_scale(emb_j)

    # ---- tile / pad selection and VMEM budget ----
    try:
        vmem_cap = int(pltpu.get_tpu_info().vmem_capacity_bytes)
    except Exception:
        vmem_cap = 64 * 2**20                     # conservative default (v7x per-TC VMEM)
    vmem_budget = int(0.75 * vmem_cap)

    def est_bytes(tb, bp):
        return (bp * D * 2                        # resident zj RHS (bf16, single buffer)
                + 2 * 2 * tb * D * 2              # two pipelined (TB, D) query blocks, 2x buffered
                + 3 * tb * bp * 4                 # S_ij + exp(S_ij) + slack (f32)
                + 2 * D * 4 + bp * 4 + 8 * tb * 4
                + (1 << 20))                      # compiler-internal scratch headroom

    if B <= 128:
        tile = _round_up(max(B, 8), 8)            # single-tile path for small batches
    else:
        tile = 128
        for tb in (512, 256):                     # bigger row tile when it divides B and fits VMEM
            if B % tb == 0 and B // tb >= 2 and est_bytes(tb, B) <= vmem_budget:
                tile = tb
                break
    b_pad = _round_up(B, tile)
    pad = b_pad - B
    num_tiles = b_pad // tile
    # TODO(synk): for very large B*D where the resident (B, D) RHS + (tile, B) temporaries
    # exceed ~75% of VMEM (mainly v7x), add a column-tiled second grid axis with online
    # den accumulation instead of the monolithic resident RHS.

    est = est_bytes(tile, b_pad)
    vmem_limit = int(min(int(0.8 * vmem_cap), max(32 * 2**20, int(1.5 * est))))

    if pad:
        zi = jnp.pad(zi, ((0, pad), (0, 0)))      # zero rows: normalize to exactly 0
        zj = jnp.pad(zj, ((0, pad), (0, 0)))

    # Column sums of the bf16-rounded z, in f32 — once, in XLA.
    csum_i = jnp.sum(zi.astype(jnp.float32), axis=0, keepdims=True)   # (1, D)
    csum_j = jnp.sum(zj.astype(jnp.float32), axis=0, keepdims=True)

    # NOTE: B == 1 divides by zero, same as the PyTorch reference.
    kernel = partial(_group_contrastive_kernel,
                     inv_bm1=1.0 / float(B - 1), pad_rows=float(pad))

    def run(single_buffer_rhs):
        if single_buffer_rhs:
            # Constant-index resident RHS: a second pipeline buffer would be dead weight.
            rhs_spec = pl.BlockSpec((b_pad, D), lambda t: (0, 0),
                                    pipeline_mode=pl.Buffered(buffer_count=1))
        else:
            rhs_spec = pl.BlockSpec((b_pad, D), lambda t: (0, 0))
        return pl.pallas_call(
            kernel,
            out_shape=(jax.ShapeDtypeStruct((b_pad, 1), jnp.float32),   # loss, i half
                       jax.ShapeDtypeStruct((b_pad, 1), jnp.float32),   # positives, j half
                       jax.ShapeDtypeStruct((1, b_pad), jnp.float32)),  # den_j accumulator
            grid=(num_tiles,),
            in_specs=[
                pl.BlockSpec((tile, D), lambda t: (t, 0)),   # zi query rows (pipelined)
                pl.BlockSpec((tile, D), lambda t: (t, 0)),   # zj query rows (pipelined)
                rhs_spec,                                    # zj resident RHS
                pl.BlockSpec((1, D), lambda t: (0, 0)),      # column sum of zi
                pl.BlockSpec((1, D), lambda t: (0, 0)),      # column sum of zj
            ],
            out_specs=(
                pl.BlockSpec((tile, 1), lambda t: (t, 0)),
                pl.BlockSpec((tile, 1), lambda t: (t, 0)),
                pl.BlockSpec((1, b_pad), lambda t: (0, 0)),  # resident across the grid
            ),
            compiler_params=pltpu.CompilerParams(
                # Sequential: den_j is accumulated across row tiles (S_ji == S_ij^T reuse).
                dimension_semantics=("arbitrary",),
                vmem_limit_bytes=vmem_limit,
            ),
        )(zi, zj, zj, csum_i, csum_j)

    try:
        loss_i, pos_j, den_j = run(True)
    except Exception:
        # Fallback for Pallas builds that reject single-buffered (pl.Buffered(1)) inputs.
        loss_i, pos_j, den_j = run(False)

    # Tiny O(B) epilogue in XLA: j-half combine (needs the complete den_j) + the mean.
    loss_i = loss_i[:B, 0]
    pos_j = pos_j[:B, 0]
    den_j = den_j[0, :B] - float(pad)             # remove the padded zi rows' exp(0)=1 terms
    loss_j = jnp.log(jnp.exp(pos_j) + den_j) - pos_j
    return (jnp.sum(loss_i) + jnp.sum(loss_j)) / (2.0 * B)


def _reference_loss(emb_i, emb_j, temperature=0.5):
    # Pure-JAX (f32) re-implementation of the PyTorch forward for verification.
    B = emb_i.shape[0]

    def l2norm(x):
        return x / jnp.maximum(jnp.linalg.norm(x, axis=1, keepdims=True), 1e-12)

    rep = jnp.concatenate([l2norm(emb_i), l2norm(emb_j)], axis=0)
    sim = rep @ rep.T
    pos_block_mask = 1.0 - jnp.eye(B)
    sim_ij = jnp.sum(sim[:B, :B] * pos_block_mask, axis=1) / (B - 1)
    sim_ji = jnp.sum(sim[B:, B:] * pos_block_mask, axis=1) / (B - 1)
    positives = jnp.concatenate([sim_ij, sim_ji], axis=0)
    numerator = jnp.exp(positives / temperature)
    neg_mask = jnp.block([[jnp.zeros((B, B)), jnp.ones((B, B))],
                          [jnp.ones((B, B)), jnp.zeros((B, B))]])
    denominator = jnp.sum(neg_mask * jnp.exp(sim / temperature), axis=1)
    loss_partial = -jnp.log(numerator / (numerator + denominator))
    return jnp.sum(loss_partial) / (2 * B)


if __name__ == "__main__":
    key = jax.random.PRNGKey(0)
    k1, k2, k3, k4, k5, k6 = jax.random.split(key, 6)

    # Small single-tile shape.
    B, D = 8, 32
    emb_i = jax.random.normal(k1, (B, D), dtype=jnp.float32)
    emb_j = jax.random.normal(k2, (B, D), dtype=jnp.float32)
    loss = group_contrastive_loss(emb_i, emb_j, temperature=0.5)
    jax.block_until_ready(loss)
    ref = _reference_loss(emb_i, emb_j, temperature=0.5)
    # bf16 MXU operands (f32 accumulation) -> ~1e-3 level error vs the pure-f32 reference.
    assert jnp.allclose(loss, ref, rtol=2e-2, atol=2e-2), (loss, ref)

    # Multi-tile path (row-tiled, den_j accumulated across tiles).
    B2, D2 = 256, 64
    emb_i2 = jax.random.normal(k3, (B2, D2), dtype=jnp.float32)
    emb_j2 = jax.random.normal(k4, (B2, D2), dtype=jnp.float32)
    loss2 = group_contrastive_loss(emb_i2, emb_j2, temperature=0.5)
    jax.block_until_ready(loss2)
    ref2 = _reference_loss(emb_i2, emb_j2, temperature=0.5)
    assert jnp.allclose(loss2, ref2, rtol=2e-2, atol=2e-2), (loss2, ref2)

    # Non-multiple batch: exercises the zero-padding + exact pad correction path.
    B3, D3 = 200, 64
    emb_i3 = jax.random.normal(k5, (B3, D3), dtype=jnp.float32)
    emb_j3 = jax.random.normal(k6, (B3, D3), dtype=jnp.float32)
    loss3 = group_contrastive_loss(emb_i3, emb_j3, temperature=0.5)
    jax.block_until_ready(loss3)
    ref3 = _reference_loss(emb_i3, emb_j3, temperature=0.5)
    assert jnp.allclose(loss3, ref3, rtol=2e-2, atol=2e-2), (loss3, ref3)

    print("KERNEL_OK")
</pallas_src>

<mosaic_0001>
module attributes {stable_mosaic.version = 11 : i64} {
  func.func @_group_contrastive_kernel(%arg0: i32, %arg1: memref<8x32xbf16, #tpu.memory_space<vmem>>, %arg2: memref<8x32xbf16, #tpu.memory_space<vmem>>, %arg3: memref<8x32xbf16, #tpu.memory_space<vmem>>, %arg4: memref<1x32xf32, #tpu.memory_space<vmem>>, %arg5: memref<1x32xf32, #tpu.memory_space<vmem>>, %arg6: memref<8x1xf32, #tpu.memory_space<vmem>>, %arg7: memref<8x1xf32, #tpu.memory_space<vmem>>, %arg8: memref<1x8xf32, #tpu.memory_space<vmem>>) attributes {dimension_semantics = [#tpu.dimension_semantics<arbitrary>], iteration_bounds = array<i64: 1>, scalar_prefetch = 0 : i64, scratch_operands = 0 : i64, tpu.core_type = #tpu.core_type<tc>, window_params = [{transform_indices = @transform_0, window_bounds = array<i64: 8, 32>}, {transform_indices = @transform_1, window_bounds = array<i64: 8, 32>}, {pipeline_mode = #tpu.pipeline_mode<synchronous>, transform_indices = @transform_2, window_bounds = array<i64: 8, 32>}, {pipeline_mode = #tpu.pipeline_mode<synchronous>, transform_indices = @transform_3, window_bounds = array<i64: 1, 32>}, {pipeline_mode = #tpu.pipeline_mode<synchronous>, transform_indices = @transform_4, window_bounds = array<i64: 1, 32>}, {transform_indices = @transform_5, window_bounds = array<i64: 8, 1>}, {transform_indices = @transform_6, window_bounds = array<i64: 8, 1>}, {pipeline_mode = #tpu.pipeline_mode<synchronous>, transform_indices = @transform_7, window_bounds = array<i64: 1, 8>}]} {
    %c0 = arith.constant 0 : index
    %c0_0 = arith.constant 0 : index
    %0 = vector.load %arg1[%c0, %c0_0] : memref<8x32xbf16, #tpu.memory_space<vmem>>, vector<8x32xbf16>
    %c0_1 = arith.constant 0 : index
    %c0_2 = arith.constant 0 : index
    %1 = vector.load %arg2[%c0_1, %c0_2] : memref<8x32xbf16, #tpu.memory_space<vmem>>, vector<8x32xbf16>
    %2 = arith.extf %0 : vector<8x32xbf16> to vector<8x32xf32>
    %3 = arith.extf %1 : vector<8x32xbf16> to vector<8x32xf32>
    %c0_3 = arith.constant 0 : index
    %c0_4 = arith.constant 0 : index
    %4 = vector.load %arg4[%c0_3, %c0_4] : memref<1x32xf32, #tpu.memory_space<vmem>>, vector<1x32xf32>
    %5 = vector.broadcast %4 : vector<1x32xf32> to vector<8x32xf32>
    %6 = arith.mulf %2, %5 : vector<8x32xf32>
    %cst = arith.constant dense<0.000000e+00> : vector<8xf32>
    %7 = vector.multi_reduction <add>, %6, %cst [1] : vector<8x32xf32> to vector<8xf32>
    %8 = vector.shape_cast %7 : vector<8xf32> to vector<8x1xf32>
    %9 = arith.mulf %2, %2 : vector<8x32xf32>
    %cst_5 = arith.constant dense<0.000000e+00> : vector<8xf32>
    %10 = vector.multi_reduction <add>, %9, %cst_5 [1] : vector<8x32xf32> to vector<8xf32>
    %11 = vector.shape_cast %10 : vector<8xf32> to vector<8x1xf32>
    %12 = arith.subf %8, %11 : vector<8x1xf32>
    %cst_6 = arith.constant 0.142857149 : f32
    %13 = vector.broadcast %cst_6 : f32 to vector<8x1xf32>
    %14 = arith.mulf %12, %13 : vector<8x1xf32>
    %c0_7 = arith.constant 0 : index
    %c0_8 = arith.constant 0 : index
    %15 = vector.load %arg5[%c0_7, %c0_8] : memref<1x32xf32, #tpu.memory_space<vmem>>, vector<1x32xf32>
    %16 = vector.broadcast %15 : vector<1x32xf32> to vector<8x32xf32>
    %17 = arith.mulf %3, %16 : vector<8x32xf32>
    %cst_9 = arith.constant dense<0.000000e+00> : vector<8xf32>
    %18 = vector.multi_reduction <add>, %17, %cst_9 [1] : vector<8x32xf32> to vector<8xf32>
    %19 = vector.shape_cast %18 : vector<8xf32> to vector<8x1xf32>
    %20 = arith.mulf %3, %3 : vector<8x32xf32>
    %cst_10 = arith.constant dense<0.000000e+00> : vector<8xf32>
    %21 = vector.multi_reduction <add>, %20, %cst_10 [1] : vector<8x32xf32> to vector<8xf32>
    %22 = vector.shape_cast %21 : vector<8xf32> to vector<8x1xf32>
    %23 = arith.subf %19, %22 : vector<8x1xf32>
    %cst_11 = arith.constant 0.142857149 : f32
    %24 = vector.broadcast %cst_11 : f32 to vector<8x1xf32>
    %25 = arith.mulf %23, %24 : vector<8x1xf32>
    %c0_12 = arith.constant 0 : index
    %c0_13 = arith.constant 0 : index
    %26 = vector.load %arg3[%c0_12, %c0_13] : memref<8x32xbf16, #tpu.memory_space<vmem>>, vector<8x32xbf16>
    %cst_14 = arith.constant dense<0.000000e+00> : vector<8x8xf32>
    %27 = tpu.matmul %0, %26, %cst_14 {dimension_numbers = #tpu.dot_dimension_numbers<[1], [1], [0], [0], [0, 0, 1, 0], [], []>} : vector<8x32xbf16>, vector<8x32xbf16>, vector<8x8xf32> -> vector<8x8xf32>
    %28 = math.exp %27 : vector<8x8xf32>
    %cst_15 = arith.constant dense<0.000000e+00> : vector<8xf32>
    %29 = vector.multi_reduction <add>, %28, %cst_15 [1] : vector<8x8xf32> to vector<8xf32>
    %30 = vector.shape_cast %29 : vector<8xf32> to vector<8x1xf32>
    %cst_16 = arith.constant 0.000000e+00 : f32
    %31 = vector.broadcast %cst_16 : f32 to vector<8x1xf32>
    %32 = arith.subf %30, %31 : vector<8x1xf32>
    %33 = math.exp %14 : vector<8x1xf32>
    %34 = arith.addf %33, %32 : vector<8x1xf32>
    %35 = math.log %34 : vector<8x1xf32>
    %36 = arith.subf %35, %14 : vector<8x1xf32>
    %c0_17 = arith.constant 0 : index
    %c0_18 = arith.constant 0 : index
    %37 = vector.load %arg6[%c0_17, %c0_18] : memref<8x1xf32, #tpu.memory_space<vmem>>, vector<8x1xf32>
    tpu.vector_store %arg6[%c0_17, %c0_18], %36 {strides = array<i32>} : memref<8x1xf32, #tpu.memory_space<vmem>>, vector<8x1xf32>,
    %c0_19 = arith.constant 0 : index
    %c0_20 = arith.constant 0 : index
    %38 = vector.load %arg7[%c0_19, %c0_20] : memref<8x1xf32, #tpu.memory_space<vmem>>, vector<8x1xf32>
    tpu.vector_store %arg7[%c0_19, %c0_20], %25 {strides = array<i32>} : memref<8x1xf32, #tpu.memory_space<vmem>>, vector<8x1xf32>,
    %cst_21 = arith.constant dense<0.000000e+00> : vector<8xf32>
    %39 = vector.multi_reduction <add>, %28, %cst_21 [0] : vector<8x8xf32> to vector<8xf32>
    %40 = vector.shape_cast %39 : vector<8xf32> to vector<1x8xf32>
    %c0_i32 = arith.constant 0 : i32
    %41 = arith.cmpi eq, %arg0, %c0_i32 : i32
    %42 = arith.extui %41 : i1 to i32
    %c0_i32_22 = arith.constant 0 : i32
    %43 = arith.cmpi ne, %42, %c0_i32_22 : i32
    scf.if %43 {
      %c0_25 = arith.constant 0 : index
      %c0_26 = arith.constant 0 : index
      %47 = vector.load %arg8[%c0_25, %c0_26] : memref<1x8xf32, #tpu.memory_space<vmem>>, vector<1x8xf32>
      tpu.vector_store %arg8[%c0_25, %c0_26], %40 {strides = array<i32>} : memref<1x8xf32, #tpu.memory_space<vmem>>, vector<1x8xf32>,
    } else {
    }
    %c0_i32_23 = arith.constant 0 : i32
    %44 = arith.cmpi ne, %arg0, %c0_i32_23 : i32
    %45 = arith.extui %44 : i1 to i32
    %c0_i32_24 = arith.constant 0 : i32
    %46 = arith.cmpi ne, %45, %c0_i32_24 : i32
    scf.if %46 {
      %c0_25 = arith.constant 0 : index
      %c0_26 = arith.constant 0 : index
      %47 = vector.load %arg8[%c0_25, %c0_26] : memref<1x8xf32, #tpu.memory_space<vmem>>, vector<1x8xf32>
      %48 = arith.addf %47, %40 : vector<1x8xf32>
      %c0_27 = arith.constant 0 : index
      %c0_28 = arith.constant 0 : index
      %49 = vector.load %arg8[%c0_27, %c0_28] : memref<1x8xf32, #tpu.memory_space<vmem>>, vector<1x8xf32>
      tpu.vector_store %arg8[%c0_27, %c0_28], %48 {strides = array<i32>} : memref<1x8xf32, #tpu.memory_space<vmem>>, vector<1x8xf32>,
    } else {
    }
    return
  }
  func.func @transform_0(%arg0: i32) -> (i32, i32) {
    %c0_i32 = arith.constant 0 : i32
    %c0_i32_0 = arith.constant 0 : i32
    return %arg0, %c0_i32 : i32, i32
  }
  func.func @transform_1(%arg0: i32) -> (i32, i32) {
    %c0_i32 = arith.constant 0 : i32
    %c0_i32_0 = arith.constant 0 : i32
    return %arg0, %c0_i32 : i32, i32
  }
  func.func @transform_2(%arg0: i32) -> (i32, i32) {
    %c0_i32 = arith.constant 0 : i32
    %c0_i32_0 = arith.constant 0 : i32
    %c0_i32_1 = arith.constant 0 : i32
    return %c0_i32, %c0_i32_0 : i32, i32
  }
  func.func @transform_3(%arg0: i32) -> (i32, i32) {
    %c0_i32 = arith.constant 0 : i32
    %c0_i32_0 = arith.constant 0 : i32
    %c0_i32_1 = arith.constant 0 : i32
    return %c0_i32, %c0_i32_0 : i32, i32
  }
  func.func @transform_4(%arg0: i32) -> (i32, i32) {
    %c0_i32 = arith.constant 0 : i32
    %c0_i32_0 = arith.constant 0 : i32
    %c0_i32_1 = arith.constant 0 : i32
    return %c0_i32, %c0_i32_0 : i32, i32
  }
  func.func @transform_5(%arg0: i32) -> (i32, i32) {
    %c0_i32 = arith.constant 0 : i32
    %c0_i32_0 = arith.constant 0 : i32
    return %arg0, %c0_i32 : i32, i32
  }
  func.func @transform_6(%arg0: i32) -> (i32, i32) {
    %c0_i32 = arith.constant 0 : i32
    %c0_i32_0 = arith.constant 0 : i32
    return %arg0, %c0_i32 : i32, i32
  }
  func.func @transform_7(%arg0: i32) -> (i32, i32) {
    %c0_i32 = arith.constant 0 : i32
    %c0_i32_0 = arith.constant 0 : i32
    %c0_i32_1 = arith.constant 0 : i32
    return %c0_i32, %c0_i32_0 : i32, i32
  }
}

module attributes {stable_mosaic.version = 11 : i64} {
  func.func @_group_contrastive_kernel(%arg0: i32, %arg1: memref<8x32xbf16, #tpu.memory_space<vmem>>, %arg2: memref<8x32xbf16, #tpu.memory_space<vmem>>, %arg3: memref<8x32xbf16, #tpu.memory_space<vmem>>, %arg4: memref<1x32xf32, #tpu.memory_space<vmem>>, %arg5: memref<1x32xf32, #tpu.memory_space<vmem>>, %arg6: memref<8x1xf32, #tpu.memory_space<vmem>>, %arg7: memref<8x1xf32, #tpu.memory_space<vmem>>, %arg8: memref<1x8xf32, #tpu.memory_space<vmem>>) attributes {dimension_semantics = [#tpu.dimension_semantics<arbitrary>], iteration_bounds = array<i64: 1>, scalar_prefetch = 0 : i64, scratch_operands = 0 : i64, tpu.core_type = #tpu.core_type<tc>, window_params = [{transform_indices = @transform_0, window_bounds = array<i64: 8, 32>}, {transform_indices = @transform_1, window_bounds = array<i64: 8, 32>}, {pipeline_mode = #tpu.pipeline_mode<synchronous>, transform_indices = @transform_2, window_bounds = array<i64: 8, 32>}, {pipeline_mode = #tpu.pipeline_mode<synchronous>, transform_indices = @transform_3, window_bounds = array<i64: 1, 32>}, {pipeline_mode = #tpu.pipeline_mode<synchronous>, transform_indices = @transform_4, window_bounds = array<i64: 1, 32>}, {transform_indices = @transform_5, window_bounds = array<i64: 8, 1>}, {transform_indices = @transform_6, window_bounds = array<i64: 8, 1>}, {pipeline_mode = #tpu.pipeline_mode<synchronous>, transform_indices = @transform_7, window_bounds = array<i64: 1, 8>}]} {
    %c0 = arith.constant 0 : index
    %c0_0 = arith.constant 0 : index
    %0 = vector.load %arg1[%c0, %c0_0] : memref<8x32xbf16, #tpu.memory_space<vmem>>, vector<8x32xbf16>
    %c0_1 = arith.constant 0 : index
    %c0_2 = arith.constant 0 : index
    %1 = vector.load %arg2[%c0_1, %c0_2] : memref<8x32xbf16, #tpu.memory_space<vmem>>, vector<8x32xbf16>
    %2 = arith.extf %0 : vector<8x32xbf16> to vector<8x32xf32>
    %3 = arith.extf %1 : vector<8x32xbf16> to vector<8x32xf32>
    %c0_3 = arith.constant 0 : index
    %c0_4 = arith.constant 0 : index
    %4 = vector.load %arg4[%c0_3, %c0_4] : memref<1x32xf32, #tpu.memory_space<vmem>>, vector<1x32xf32>
    %5 = vector.broadcast %4 : vector<1x32xf32> to vector<8x32xf32>
    %6 = arith.mulf %2, %5 : vector<8x32xf32>
    %cst = arith.constant dense<0.000000e+00> : vector<8xf32>
    %7 = vector.multi_reduction <add>, %6, %cst [1] : vector<8x32xf32> to vector<8xf32>
    %8 = vector.shape_cast %7 : vector<8xf32> to vector<8x1xf32>
    %9 = arith.mulf %2, %2 : vector<8x32xf32>
    %cst_5 = arith.constant dense<0.000000e+00> : vector<8xf32>
    %10 = vector.multi_reduction <add>, %9, %cst_5 [1] : vector<8x32xf32> to vector<8xf32>
    %11 = vector.shape_cast %10 : vector<8xf32> to vector<8x1xf32>
    %12 = arith.subf %8, %11 : vector<8x1xf32>
    %cst_6 = arith.constant 0.142857149 : f32
    %13 = vector.broadcast %cst_6 : f32 to vector<8x1xf32>
    %14 = arith.mulf %12, %13 : vector<8x1xf32>
    %c0_7 = arith.constant 0 : index
    %c0_8 = arith.constant 0 : index
    %15 = vector.load %arg5[%c0_7, %c0_8] : memref<1x32xf32, #tpu.memory_space<vmem>>, vector<1x32xf32>
    %16 = vector.broadcast %15 : vector<1x32xf32> to vector<8x32xf32>
    %17 = arith.mulf %3, %16 : vector<8x32xf32>
    %cst_9 = arith.constant dense<0.000000e+00> : vector<8xf32>
    %18 = vector.multi_reduction <add>, %17, %cst_9 [1] : vector<8x32xf32> to vector<8xf32>
    %19 = vector.shape_cast %18 : vector<8xf32> to vector<8x1xf32>
    %20 = arith.mulf %3, %3 : vector<8x32xf32>
    %cst_10 = arith.constant dense<0.000000e+00> : vector<8xf32>
    %21 = vector.multi_reduction <add>, %20, %cst_10 [1] : vector<8x32xf32> to vector<8xf32>
    %22 = vector.shape_cast %21 : vector<8xf32> to vector<8x1xf32>
    %23 = arith.subf %19, %22 : vector<8x1xf32>
    %cst_11 = arith.constant 0.142857149 : f32
    %24 = vector.broadcast %cst_11 : f32 to vector<8x1xf32>
    %25 = arith.mulf %23, %24 : vector<8x1xf32>
    %c0_12 = arith.constant 0 : index
    %c0_13 = arith.constant 0 : index
    %26 = vector.load %arg3[%c0_12, %c0_13] : memref<8x32xbf16, #tpu.memory_space<vmem>>, vector<8x32xbf16>
    %cst_14 = arith.constant dense<0.000000e+00> : vector<8x8xf32>
    %27 = tpu.matmul %0, %26, %cst_14 {dimension_numbers = #tpu.dot_dimension_numbers<[1], [1], [0], [0], [0, 0, 1, 0], [], []>} : vector<8x32xbf16>, vector<8x32xbf16>, vector<8x8xf32> -> vector<8x8xf32>
    %28 = math.exp %27 : vector<8x8xf32>
    %cst_15 = arith.constant dense<0.000000e+00> : vector<8xf32>
    %29 = vector.multi_reduction <add>, %28, %cst_15 [1] : vector<8x8xf32> to vector<8xf32>
    %30 = vector.shape_cast %29 : vector<8xf32> to vector<8x1xf32>
    %cst_16 = arith.constant 0.000000e+00 : f32
    %31 = vector.broadcast %cst_16 : f32 to vector<8x1xf32>
    %32 = arith.subf %30, %31 : vector<8x1xf32>
    %33 = math.exp %14 : vector<8x1xf32>
    %34 = arith.addf %33, %32 : vector<8x1xf32>
    %35 = math.log %34 : vector<8x1xf32>
    %36 = arith.subf %35, %14 : vector<8x1xf32>
    %c0_17 = arith.constant 0 : index
    %c0_18 = arith.constant 0 : index
    %37 = vector.load %arg6[%c0_17, %c0_18] : memref<8x1xf32, #tpu.memory_space<vmem>>, vector<8x1xf32>
    tpu.vector_store %arg6[%c0_17, %c0_18], %36 {strides = array<i32>} : memref<8x1xf32, #tpu.memory_space<vmem>>, vector<8x1xf32>,
    %c0_19 = arith.constant 0 : index
    %c0_20 = arith.constant 0 : index
    %38 = vector.load %arg7[%c0_19, %c0_20] : memref<8x1xf32, #tpu.memory_space<vmem>>, vector<8x1xf32>
    tpu.vector_store %arg7[%c0_19, %c0_20], %25 {strides = array<i32>} : memref<8x1xf32, #tpu.memory_space<vmem>>, vector<8x1xf32>,
    %cst_21 = arith.constant dense<0.000000e+00> : vector<8xf32>
    %39 = vector.multi_reduction <add>, %28, %cst_21 [0] : vector<8x8xf32> to vector<8xf32>
    %40 = vector.shape_cast %39 : vector<8xf32> to vector<1x8xf32>
    %c0_i32 = arith.constant 0 : i32
    %41 = arith.cmpi eq, %arg0, %c0_i32 : i32
    %42 = arith.extui %41 : i1 to i32
    %c0_i32_22 = arith.constant 0 : i32
    %43 = arith.cmpi ne, %42, %c0_i32_22 : i32
    scf.if %43 {
      %c0_25 = arith.constant 0 : index
      %c0_26 = arith.constant 0 : index
      %47 = vector.load %arg8[%c0_25, %c0_26] : memref<1x8xf32, #tpu.memory_space<vmem>>, vector<1x8xf32>
      tpu.vector_store %arg8[%c0_25, %c0_26], %40 {strides = array<i32>} : memref<1x8xf32, #tpu.memory_space<vmem>>, vector<1x8xf32>,
    } else {
    }
    %c0_i32_23 = arith.constant 0 : i32
    %44 = arith.cmpi ne, %arg0, %c0_i32_23 : i32
    %45 = arith.extui %44 : i1 to i32
    %c0_i32_24 = arith.constant 0 : i32
    %46 = arith.cmpi ne, %45, %c0_i32_24 : i32
    scf.if %46 {
      %c0_25 = arith.constant 0 : index
      %c0_26 = arith.constant 0 : index
      %47 = vector.load %arg8[%c0_25, %c0_26] : memref<1x8xf32, #tpu.memory_space<vmem>>, vector<1x8xf32>
      %48 = arith.addf %47, %40 : vector<1x8xf32>
      %c0_27 = arith.constant 0 : index
      %c0_28 = arith.constant 0 : index
      %49 = vector.load %arg8[%c0_27, %c0_28] : memref<1x8xf32, #tpu.memory_space<vmem>>, vector<1x8xf32>
      tpu.vector_store %arg8[%c0_27, %c0_28], %48 {strides = array<i32>} : memref<1x8xf32, #tpu.memory_space<vmem>>, vector<1x8xf32>,
    } else {
    }
    return
  }
  func.func @transform_0(%arg0: i32) -> (i32, i32) {
    %c0_i32 = arith.constant 0 : i32
    %c0_i32_0 = arith.constant 0 : i32
    return %arg0, %c0_i32 : i32, i32
  }
  func.func @transform_1(%arg0: i32) -> (i32, i32) {
    %c0_i32 = arith.constant 0 : i32
    %c0_i32_0 = arith.constant 0 : i32
    return %arg0, %c0_i32 : i32, i32
  }
  func.func @transform_2(%arg0: i32) -> (i32, i32) {
    %c0_i32 = arith.constant 0 : i32
    %c0_i32_0 = arith.constant 0 : i32
    %c0_i32_1 = arith.constant 0 : i32
    return %c0_i32, %c0_i32_0 : i32, i32
  }
  func.func @transform_3(%arg0: i32) -> (i32, i32) {
    %c0_i32 = arith.constant 0 : i32
    %c0_i32_0 = arith.constant 0 : i32
    %c0_i32_1 = arith.constant 0 : i32
    return %c0_i32, %c0_i32_0 : i32, i32
  }
  func.func @transform_4(%arg0: i32) -> (i32, i32) {
    %c0_i32 = arith.constant 0 : i32
    %c0_i32_0 = arith.constant 0 : i32
    %c0_i32_1 = arith.constant 0 : i32
    return %c0_i32, %c0_i32_0 : i32, i32
  }
  func.func @transform_5(%arg0: i32) -> (i32, i32) {
    %c0_i32 = arith.constant 0 : i32
    %c0_i32_0 = arith.constant 0 : i32
    return %arg0, %c0_i32 : i32, i32
  }
  func.func @transform_6(%arg0: i32) -> (i32, i32) {
    %c0_i32 = arith.constant 0 : i32
    %c0_i32_0 = arith.constant 0 : i32
    return %arg0, %c0_i32 : i32, i32
  }
  func.func @transform_7(%arg0: i32) -> (i32, i32) {
    %c0_i32 = arith.constant 0 : i32
    %c0_i32_0 = arith.constant 0 : i32
    %c0_i32_1 = arith.constant 0 : i32
    return %c0_i32, %c0_i32_0 : i32, i32
  }
}

</mosaic_0001>

<bundles_post_ra>
// kernel: tpu_custom_call.1
= control target key start
LH: loop header
LB: loop body
LE: loop exit
PB: predicated region body
PF: predicated region fallthrough
CT: control target
= control target key end

     0   :  { %13 = vsyncpa [#allocation3], 0  ;;  %s369_s0 = inlined_call_operand.hbm [shape: bf16[8,32], index: 0, kind: input, shape index: {}]   ;;  %s370_s1 = inlined_call_operand.hbm [shape: bf16[8,32], index: 1, kind: input, shape index: {}]   ;;  %s371_s2 = inlined_call_operand.hbm [shape: bf16[8,32], index: 2, kind: input, shape index: {}]   ;;  %s372_s3 = inlined_call_operand.vmem [shape: f32[1,32], index: 3, kind: input, shape index: {}]   ;;  %s373_s4 = inlined_call_operand.vmem [shape: f32[1,32], index: 4, kind: input, shape index: {}]   ;;  %s374_s5 = inlined_call_operand.vmem [shape: f32[8,1], index: 5, kind: output, shape index: {0}]   ;;  %s375_s6 = inlined_call_operand.vmem [shape: f32[8,1], index: 6, kind: output, shape index: {1}]   ;;  %s376_s7 = inlined_call_operand.hbm [shape: f32[1,8], index: 7, kind: output, shape index: {2}]  }
   0x1   :  { %14 = vsyncpa [#allocation6], 0  ;;  %s32_s26 = sshll.u32 %s370_s1, 4  ;;  %s33_s26 = int_to_ptr.hbm [resolvable:$true] %s32_s26 }
   0x2   :  { %15 = vsyncpa [#allocation4], 0  ;;  %s295_s27 = smov [#allocation5]   ;;  %s21_s8 = sshll.u32 %s369_s0, 4  ;;  %s22_s8 = int_to_ptr.hbm [resolvable:$true] %s21_s8 }
   0x3   :  { %s34_s28 = sshll.u32 %s295_s27, 4  ;;  %s296_s9 = smov [#allocation2]   ;;  %s35_s28 = int_to_ptr.vmem [resolvable:$true] %s34_s28 }
   0x4   :  { %37 = dma.hbm_to_vmem [thread:$0]  %s33_s26, 64, %s35_s28, [#allocation6]  }
   0x5   :  { %s23_s10 = sshll.u32 %s296_s9, 4  ;;  %s43_s13 = sshll.u32 %s371_s2, 4  ;;  %s24_s10 = int_to_ptr.vmem [resolvable:$true] %s23_s10  ;;  %s44_s13 = int_to_ptr.hbm [resolvable:$true] %s43_s13 }
   0x6   :  { %26 = dma.hbm_to_vmem [thread:$0]  %s22_s8, 64, %s24_s10, [#allocation3]  }
   0x7   :  { %s297_s1 = smov [#allocation7]  }
   0x8   :  { %s45_s14 = sshll.u32 %s297_s1, 4  ;;  %s46_s14 = int_to_ptr.vmem [resolvable:$true] %s45_s14 }
   0x9   :  { %48 = dma.hbm_to_vmem [thread:$0]  %s44_s13, 64, %s46_s14, [#allocation6]  }
   0xa   :  { %289 = dma.done.wait [#allocation3], 64  }
   0xb   :  { %290 = vsyncadd [#allocation3], 4294967232 }
   0xc   :  { %291 = dma.done.wait [#allocation6], 128  }
   0xd   :  { %292 = vsyncadd [#allocation6], 4294967168  ;;  %vm75_vm0 = vcmask 261120   ;;  %v99_v0 = vld [vmem:[#allocation7] sm:$0xf]  ;;  %vm121_vm1 = vcmask 64512  }
   0xe   :  { %v66_v1 = vld [vmem:[#allocation2] sm:$0xf]  ;;  %v104_v2 = vsel %vm75_vm0, %v99_v0, 0  ;;  %v67_v9 = vld [vmem:[#allocation5] sm:$0xf]  ;;  %s298_s16 = smov [#allocation8]  }
   0xf   :  { %v68_v3 = vunpack.c.l.bf16 %v66_v1  ;;  %v185_v4 = vld [vmem:[%s372_s3] ss:$0 sm:$0xff]  ;;  %113 = vmatpush.bf16.xpose.msra.mxu0 %v104_v2  ;;  %v69_v10 = vunpack.c.l.bf16 %v67_v9  ;;  %s163_s17 = sshll.u32 %s298_s16, 4  ;;  %s165_s20 = sshll.u32 %s376_s7, 4  ;;  %vm144_vm2 = vcmask 57344   ;;  %vm131_vm3 = vcmask 7168   ;;  %s164_s17 = int_to_ptr.vmem [resolvable:$true] %s163_s17  ;;  %s166_s20 = int_to_ptr.hbm [resolvable:$true] %s165_s20 }
  0x10   :  { %v186_v16 = vld [vmem:[%s373_s4] ss:$0 sm:$0xff] }
  0x11   :  { %v74_v5 = vmul.f32 %v185_v4, %v68_v3  ;;  %v79_v7 = vmul.f32 %v68_v3, %v68_v3  ;;  %v93_v11 = vmul.f32 %v69_v10, %v69_v10  ;;  %v89_v20 = vmul.f32 %v186_v16, %v69_v10 }
  0x13   :  { %v76_v6 = vsel %vm75_vm0, %v74_v5, 0.0  ;;  %v80_v8 = vsel %vm75_vm0, %v79_v7, 0.0  ;;  %v94_v12 = vsel %vm75_vm0, %v93_v11, 0.0  ;;  %v90_v23 = vsel %vm75_vm0, %v89_v20, 0.0 }
  0x14   :  { %77 = vadd.xlane.f32.xlu0 %v76_v6  ;;  %95 = vadd.xlane.f32.xlu2 %v94_v12 }
  0x16   :  { %180 = vmatmul.msk.bf16.vlgmr.msra.gmra.mxu0 %vm75_vm0, %v66_v1 }
  0x1c   :  { %81 = vadd.xlane.f32.xlu0 %v80_v8 }
  0x87   :  { %v78_v27 = vpop.xlane.xlu0 %77  ;;  %v96_v35 = vpop.xlane.xlu2 %95 }
  0x8f   :  { %v82_v28 = vpop.xlane.xlu0 %81 }
  0x90   :  { %v83_v29 = vsub.f32 %v78_v27, %v82_v28 }
  0x92   :  { %v84_v30 = vmul.f32 0.14285715, %v83_v29 }
  0x93   :  { %v115_v13 = vpop.f32.mrf.mxu0 }
  0x94   :  { %v119_v14 = vmul.f32 1.442695, %v115_v13  ;;  %v125_v31 = vmul.f32 1.442695, %v84_v30 }
  0x96   :  { %187 = vpow2.f32 %v119_v14 }
  0x97   :  { %189 = vpow2.f32 %v125_v31 }
  0x9b   :  { %v117_v15 = vpop.f32.mrf.mxu0 }
  0x9c   :  { %v188_v17 = vpop.eup %187 }
  0x9d   :  { %v122_v18 = vsel %vm121_vm1, %v188_v17, 0.0  ;;  %v190_v32 = vpop.eup %189 }
  0x9e   :  { %123 = vadd.xlane.f32.xlu1 %v122_v18  ;;  %v134_v19 = vrot.slane %v122_v18, 4 }
  0xa0   :  { %v135_v21 = vadd.f32 %v134_v19, %v122_v18 }
  0xa2   :  { %v136_v22 = vrot.slane %v135_v21, 2 }
  0xa4   :  { %v137_v24 = vadd.f32 %v136_v22, %v135_v21 }
  0xa6   :  { %v138_v25 = vrot.slane %v137_v24, 1  ;;  %91 = vadd.xlane.f32.xlu1 %v90_v23 }
  0xa8   :  { %v139_v26 = vadd.f32 %v138_v25, %v137_v24 }
  0xaa   :  { %145 = vst.msk [vmem:[#allocation8] sm:$0x1] %vm144_vm2, %v139_v26 }
  0xab   :  { %168 = dma.vmem_to_hbm [thread:$0]  %s164_s17, 16, %s166_s20, [#allocation4]  }
 0x111   :  { %v124_v33 = vpop.xlane.xlu1 %123 }
 0x112   :  { %v127_v34 = vadd.f32 %v190_v32, %v124_v33 }
 0x114   :  { %191 = vlog2.f32 %v127_v34 }
 0x119   :  { %v92_v36 = vpop.xlane.xlu1 %91 }
 0x11a   :  { %v192_v37 = vpop.eup %191  ;;  %v97_v38 = vsub.f32 %v92_v36, %v96_v35 }
 0x11b   :  { %v129_v39 = vmul.f32 0.6931472, %v192_v37 }
 0x11c   :  { %v98_v40 = vmul.f32 0.14285715, %v97_v38 }
 0x11d   :  { %v130_v41 = vsub.f32 %v129_v39, %v84_v30 }
 0x11e   :  { %133 = vst.msk [vmem:[%s375_s6] sm:$0xff] %vm131_vm3, %v98_v40 }
 0x11f   :  { %132 = vst.msk [vmem:[%s374_s5] sm:$0xff] %vm131_vm3, %v130_v41 }
 0x120   :  { %293 = dma.done.wait [#allocation4], 16  }
 0x121   :  { %294 = vsyncadd [#allocation4], 4294967280 }
 0x122   :  { %177 = vsyncpa [#allocation3], 1 }
 0x123   :  { %178 = vsyncpa [#allocation6], 1 }
 0x124   :  { %179 = vsyncpa [#allocation4], 1 }

// kernel: tpu_custom_call.1
= control target key start
LH: loop header
LB: loop body
LE: loop exit
PB: predicated region body
PF: predicated region fallthrough
CT: control target
= control target key end

     0   :  { %13 = vsyncpa [#allocation3], 0  ;;  %s369_s0 = inlined_call_operand.hbm [shape: bf16[8,32], index: 0, kind: input, shape index: {}]   ;;  %s370_s1 = inlined_call_operand.hbm [shape: bf16[8,32], index: 1, kind: input, shape index: {}]   ;;  %s371_s2 = inlined_call_operand.hbm [shape: bf16[8,32], index: 2, kind: input, shape index: {}]   ;;  %s372_s3 = inlined_call_operand.vmem [shape: f32[1,32], index: 3, kind: input, shape index: {}]   ;;  %s373_s4 = inlined_call_operand.vmem [shape: f32[1,32], index: 4, kind: input, shape index: {}]   ;;  %s374_s5 = inlined_call_operand.vmem [shape: f32[8,1], index: 5, kind: output, shape index: {0}]   ;;  %s375_s6 = inlined_call_operand.vmem [shape: f32[8,1], index: 6, kind: output, shape index: {1}]   ;;  %s376_s7 = inlined_call_operand.hbm [shape: f32[1,8], index: 7, kind: output, shape index: {2}]  }
   0x1   :  { %14 = vsyncpa [#allocation6], 0  ;;  %s32_s26 = sshll.u32 %s370_s1, 4  ;;  %s33_s26 = int_to_ptr.hbm [resolvable:$true] %s32_s26 }
   0x2   :  { %15 = vsyncpa [#allocation4], 0  ;;  %s295_s27 = smov [#allocation5]   ;;  %s21_s8 = sshll.u32 %s369_s0, 4  ;;  %s22_s8 = int_to_ptr.hbm [resolvable:$true] %s21_s8 }
   0x3   :  { %s34_s28 = sshll.u32 %s295_s27, 4  ;;  %s296_s9 = smov [#allocation2]   ;;  %s35_s28 = int_to_ptr.vmem [resolvable:$true] %s34_s28 }
   0x4   :  { %37 = dma.hbm_to_vmem [thread:$0]  %s33_s26, 64, %s35_s28, [#allocation6]  }
   0x5   :  { %s23_s10 = sshll.u32 %s296_s9, 4  ;;  %s43_s13 = sshll.u32 %s371_s2, 4  ;;  %s24_s10 = int_to_ptr.vmem [resolvable:$true] %s23_s10  ;;  %s44_s13 = int_to_ptr.hbm [resolvable:$true] %s43_s13 }
   0x6   :  { %26 = dma.hbm_to_vmem [thread:$0]  %s22_s8, 64, %s24_s10, [#allocation3]  }
   0x7   :  { %s297_s1 = smov [#allocation7]  }
   0x8   :  { %s45_s14 = sshll.u32 %s297_s1, 4  ;;  %s46_s14 = int_to_ptr.vmem [resolvable:$true] %s45_s14 }
   0x9   :  { %48 = dma.hbm_to_vmem [thread:$0]  %s44_s13, 64, %s46_s14, [#allocation6]  }
   0xa   :  { %289 = dma.done.wait [#allocation3], 64  }
   0xb   :  { %290 = vsyncadd [#allocation3], 4294967232 }
   0xc   :  { %291 = dma.done.wait [#allocation6], 128  }
   0xd   :  { %292 = vsyncadd [#allocation6], 4294967168  ;;  %vm75_vm0 = vcmask 261120   ;;  %v99_v0 = vld [vmem:[#allocation7] sm:$0xf]  ;;  %vm121_vm1 = vcmask 64512  }
   0xe   :  { %v66_v1 = vld [vmem:[#allocation2] sm:$0xf]  ;;  %v104_v2 = vsel %vm75_vm0, %v99_v0, 0  ;;  %v67_v9 = vld [vmem:[#allocation5] sm:$0xf]  ;;  %s298_s16 = smov [#allocation8]  }
   0xf   :  { %v68_v3 = vunpack.c.l.bf16 %v66_v1  ;;  %v185_v4 = vld [vmem:[%s372_s3] ss:$0 sm:$0xff]  ;;  %113 = vmatpush.bf16.xpose.msra.mxu0 %v104_v2  ;;  %v69_v10 = vunpack.c.l.bf16 %v67_v9  ;;  %s163_s17 = sshll.u32 %s298_s16, 4  ;;  %s165_s20 = sshll.u32 %s376_s7, 4  ;;  %vm144_vm2 = vcmask 57344   ;;  %vm131_vm3 = vcmask 7168   ;;  %s164_s17 = int_to_ptr.vmem [resolvable:$true] %s163_s17  ;;  %s166_s20 = int_to_ptr.hbm [resolvable:$true] %s165_s20 }
  0x10   :  { %v186_v16 = vld [vmem:[%s373_s4] ss:$0 sm:$0xff] }
  0x11   :  { %v74_v5 = vmul.f32 %v185_v4, %v68_v3  ;;  %v79_v7 = vmul.f32 %v68_v3, %v68_v3  ;;  %v93_v11 = vmul.f32 %v69_v10, %v69_v10  ;;  %v89_v20 = vmul.f32 %v186_v16, %v69_v10 }
  0x13   :  { %v76_v6 = vsel %vm75_vm0, %v74_v5, 0.0  ;;  %v80_v8 = vsel %vm75_vm0, %v79_v7, 0.0  ;;  %v94_v12 = vsel %vm75_vm0, %v93_v11, 0.0  ;;  %v90_v23 = vsel %vm75_vm0, %v89_v20, 0.0 }
  0x14   :  { %77 = vadd.xlane.f32.xlu0 %v76_v6  ;;  %95 = vadd.xlane.f32.xlu2 %v94_v12 }
  0x16   :  { %180 = vmatmul.msk.bf16.vlgmr.msra.gmra.mxu0 %vm75_vm0, %v66_v1 }
  0x1c   :  { %81 = vadd.xlane.f32.xlu0 %v80_v8 }
  0x87   :  { %v78_v27 = vpop.xlane.xlu0 %77  ;;  %v96_v35 = vpop.xlane.xlu2 %95 }
  0x8f   :  { %v82_v28 = vpop.xlane.xlu0 %81 }
  0x90   :  { %v83_v29 = vsub.f32 %v78_v27, %v82_v28 }
  0x92   :  { %v84_v30 = vmul.f32 0.14285715, %v83_v29 }
  0x93   :  { %v115_v13 = vpop.f32.mrf.mxu0 }
  0x94   :  { %v119_v14 = vmul.f32 1.442695, %v115_v13  ;;  %v125_v31 = vmul.f32 1.442695, %v84_v30 }
  0x96   :  { %187 = vpow2.f32 %v119_v14 }
  0x97   :  { %189 = vpow2.f32 %v125_v31 }
  0x9b   :  { %v117_v15 = vpop.f32.mrf.mxu0 }
  0x9c   :  { %v188_v17 = vpop.eup %187 }
  0x9d   :  { %v122_v18 = vsel %vm121_vm1, %v188_v17, 0.0  ;;  %v190_v32 = vpop.eup %189 }
  0x9e   :  { %123 = vadd.xlane.f32.xlu1 %v122_v18  ;;  %v134_v19 = vrot.slane %v122_v18, 4 }
  0xa0   :  { %v135_v21 = vadd.f32 %v134_v19, %v122_v18 }
  0xa2   :  { %v136_v22 = vrot.slane %v135_v21, 2 }
  0xa4   :  { %v137_v24 = vadd.f32 %v136_v22, %v135_v21 }
  0xa6   :  { %v138_v25 = vrot.slane %v137_v24, 1  ;;  %91 = vadd.xlane.f32.xlu1 %v90_v23 }
  0xa8   :  { %v139_v26 = vadd.f32 %v138_v25, %v137_v24 }
  0xaa   :  { %145 = vst.msk [vmem:[#allocation8] sm:$0x1] %vm144_vm2, %v139_v26 }
  0xab   :  { %168 = dma.vmem_to_hbm [thread:$0]  %s164_s17, 16, %s166_s20, [#allocation4]  }
 0x111   :  { %v124_v33 = vpop.xlane.xlu1 %123 }
 0x112   :  { %v127_v34 = vadd.f32 %v190_v32, %v124_v33 }
 0x114   :  { %191 = vlog2.f32 %v127_v34 }
 0x119   :  { %v92_v36 = vpop.xlane.xlu1 %91 }
 0x11a   :  { %v192_v37 = vpop.eup %191  ;;  %v97_v38 = vsub.f32 %v92_v36, %v96_v35 }
 0x11b   :  { %v129_v39 = vmul.f32 0.6931472, %v192_v37 }
 0x11c   :  { %v98_v40 = vmul.f32 0.14285715, %v97_v38 }
 0x11d   :  { %v130_v41 = vsub.f32 %v129_v39, %v84_v30 }
 0x11e   :  { %133 = vst.msk [vmem:[%s375_s6] sm:$0xff] %vm131_vm3, %v98_v40 }
 0x11f   :  { %132 = vst.msk [vmem:[%s374_s5] sm:$0xff] %vm131_vm3, %v130_v41 }
 0x120   :  { %293 = dma.done.wait [#allocation4], 16  }
 0x121   :  { %294 = vsyncadd [#allocation4], 4294967280 }
 0x122   :  { %177 = vsyncpa [#allocation3], 1 }
 0x123   :  { %178 = vsyncpa [#allocation6], 1 }
 0x124   :  { %179 = vsyncpa [#allocation4], 1 }

</bundles_post_ra>
